<compile_context>
chip_gen: v6e
topology: v6e:2x2x1
jax: 0.10.0
libtpu: 0.0.40
codegen_flags: <defaults>
</compile_context>

<pallas_src>
import math

import jax
import jax.numpy as jnp
from jax.experimental import pallas as pl
from jax.experimental.pallas import tpu as pltpu


# ---------------------------------------------------------------------------
# Kernel: grid = (token tiles, hidden blocks); hidden axis is a reduction.
# ---------------------------------------------------------------------------
def _ffn_kernel(x_ref, w1_ref, b1_ref, w2_ref, b2_ref, o_ref, acc_ref):
    h_step = pl.program_id(1)

    @pl.when(h_step == 0)
    def _init():
        acc_ref[...] = jnp.zeros_like(acc_ref)

    x = x_ref[...]                                                  # (tm, E)
    h = jnp.dot(x, w1_ref[...], preferred_element_type=jnp.float32)  # (tm, th)
    h = jnp.maximum(h + b1_ref[...], 0.0)                           # bias+ReLU in f32
    p = h.astype(w2_ref.dtype)                                      # MXU dtype
    acc_ref[...] += jnp.dot(p, w2_ref[...],
                            preferred_element_type=jnp.float32)     # (tm, E) f32

    @pl.when(h_step == pl.num_programs(1) - 1)
    def _finalize():
        o_ref[...] = (acc_ref[...] + b2_ref[...]).astype(o_ref.dtype)


# ---------------------------------------------------------------------------
# Planning helpers
# ---------------------------------------------------------------------------
def _round_up(a: int, b: int) -> int:
    return ((a + b - 1) // b) * b


def _cdiv(a: int, b: int) -> int:
    return -(-a // b)


def _vmem_budget_bytes() -> int:
    """Usable VMEM budget, derived from the actual chip when queryable."""
    cap = 128 * 1024 * 1024
    try:
        info = pltpu.get_tpu_info()
        for attr in ("vmem_capacity_bytes", "vmem_bytes", "vmem_size_bytes"):
            val = getattr(info, attr, None)
            if val:
                cap = int(val)
                break
    except Exception:
        pass  # API drift / not queryable -> conservative default
    # Headroom for Mosaic internal scratch; ~52 MiB on v7x, ~100 MiB on v5e/v6e.
    return min(int(cap * 0.80), 100 * 1024 * 1024)


def _plan_tiles(M, E_pad, H, cd_bytes, out_bytes, budget, hidden_block):
    """Return (tm, th, H_pad, single_buffer_weights)."""
    packing = 16 if cd_bytes <= 2 else 8          # bf16 packs 16 rows per vreg
    max_tm = 2048 if cd_bytes <= 2 else 1024

    tm = min(max_tm, _round_up(_cdiv(M, 2), packing))   # >=2 steps for v7x TCs
    tm = max(packing, min(tm, _round_up(M, packing)))

    bias_bytes = 4 * (_round_up(H, 128) + E_pad) * 2
    slack = 2 * 1024 * 1024

    def fits(tm_, th_, w_bufs):
        w = w_bufs * 2 * E_pad * th_ * cd_bytes           # W1 + W2 blocks
        io = 2 * tm_ * E_pad * (cd_bytes + out_bytes)     # x + out, double-buffered
        acc = tm_ * E_pad * 4                             # f32 accumulator
        return w + io + acc + bias_bytes + slack <= budget

    if hidden_block is not None:                  # caller-forced H tiling
        th = min(_round_up(hidden_block, 128), _round_up(H, 128))
        single = th >= H
        while tm > packing and not fits(tm, th, 1 if single else 2):
            tm = max(packing, tm // 2)
        return tm, th, _round_up(H, th), single

    # 1) Fully resident, single-buffered weights (preferred).
    t_floor = min(tm, 512)
    t = tm
    while True:
        if fits(t, H, 1):
            return t, H, H, True
        if t <= t_floor:
            break
        t = max(t_floor, t // 2)

    # 2) Stream W1/W2 along H in multiple-of-128 blocks, double-buffered.
    th = _round_up(H, 128)
    while th > 128 and not fits(tm, th, 2):
        th -= 128
    while tm > packing and not fits(tm, th, 2):
        tm = max(packing, tm // 2)
    return tm, th, _round_up(H, th), False


# ---------------------------------------------------------------------------
# Wrapper
# ---------------------------------------------------------------------------
def feed_forward(x, w1, b1, w2, b2, *, compute_dtype=None, hidden_block=None):
    """x: (..., E).  w1: (E, H), b1: (H,), w2: (H, E), b2: (E,)."""
    orig_shape = x.shape
    E = int(orig_shape[-1])
    H = int(w1.shape[1])
    assert w1.shape == (E, H) and w2.shape == (H, E)
    assert b1.shape == (H,) and b2.shape == (E,)

    out_dtype = x.dtype
    if compute_dtype is None:
        compute_dtype = jnp.bfloat16 if x.dtype == jnp.float32 else x.dtype
    cd = jnp.dtype(compute_dtype)
    cd_bytes = cd.itemsize
    out_bytes = jnp.dtype(out_dtype).itemsize

    M = math.prod(orig_shape[:-1])
    E_pad = _round_up(E, 128)                      # lane-dense in/out last dim

    budget = _vmem_budget_bytes()
    tm, th, H_pad, single_buf = _plan_tiles(M, E_pad, H, cd_bytes, out_bytes,
                                            budget, hidden_block)
    num_h = H_pad // th
    grid = (_cdiv(M, tm), num_h)

    # ---- operand prep (all zero-padding below is mathematically exact) ----
    x2 = x.reshape(M, E).astype(cd)
    w1c = w1.astype(cd)
    w2c = w2.astype(cd)
    b1f = b1.astype(jnp.float32).reshape(1, H)
    b2f = b2.astype(jnp.float32).reshape(1, E)
    if E_pad != E:
        x2 = jnp.pad(x2, ((0, 0), (0, E_pad - E)))
        w1c = jnp.pad(w1c, ((0, E_pad - E), (0, 0)))
        w2c = jnp.pad(w2c, ((0, 0), (0, E_pad - E)))
        b2f = jnp.pad(b2f, ((0, 0), (0, E_pad - E)))
    if H_pad != H:
        w1c = jnp.pad(w1c, ((0, 0), (0, H_pad - H)))
        w2c = jnp.pad(w2c, ((0, H_pad - H), (0, 0)))
        b1f = jnp.pad(b1f, ((0, 0), (0, H_pad - H)))

    cost = pl.CostEstimate(
        flops=4 * M * E_pad * H_pad,
        transcendentals=0,
        bytes_accessed=(x2.size * cd_bytes + (w1c.size + w2c.size) * cd_bytes
                        + (b1f.size + b2f.size) * 4 + M * E_pad * out_bytes))

    def build(use_single_buffer):
        w_kwargs = {}
        if use_single_buffer and hasattr(pl, "Buffered"):
            w_kwargs = dict(pipeline_mode=pl.Buffered(1))
        in_specs = [
            pl.BlockSpec((tm, E_pad), lambda i, h: (i, 0)),              # x tile
            pl.BlockSpec((E_pad, th), lambda i, h: (0, h), **w_kwargs),  # W1
            pl.BlockSpec((1, th),     lambda i, h: (0, h), **w_kwargs),  # b1
            pl.BlockSpec((th, E_pad), lambda i, h: (h, 0), **w_kwargs),  # W2
            pl.BlockSpec((1, E_pad),  lambda i, h: (0, 0), **w_kwargs),  # b2
        ]
        out_specs = pl.BlockSpec((tm, E_pad), lambda i, h: (i, 0))
        return pl.pallas_call(
            _ffn_kernel,
            out_shape=jax.ShapeDtypeStruct((M, E_pad), out_dtype),
            grid_spec=pltpu.PrefetchScalarGridSpec(
                num_scalar_prefetch=0,
                grid=grid,
                in_specs=in_specs,
                out_specs=out_specs,
                scratch_shapes=[pltpu.VMEM((tm, E_pad), jnp.float32)],
            ),
            compiler_params=pltpu.CompilerParams(
                dimension_semantics=("parallel", "arbitrary"),
                vmem_limit_bytes=int(budget),
            ),
            cost_estimate=cost,
        )

    if single_buf and num_h == 1:
        try:
            out2d = build(True)(x2, w1c, b1f, w2c, b2f)
        except Exception:
            # pl.Buffered(1) unsupported by this JAX -> double-buffer weights.
            out2d = build(False)(x2, w1c, b1f, w2c, b2f)
    else:
        out2d = build(False)(x2, w1c, b1f, w2c, b2f)

    if E_pad != E:
        out2d = out2d[:, :E]
    return out2d.reshape(orig_shape)


# ---------------------------------------------------------------------------
# Self-test
# ---------------------------------------------------------------------------
if __name__ == "__main__":
    key = jax.random.PRNGKey(0)
    kx, kw1, kb1, kw2, kb2, kx2, kw3, kb3, kw4, kb4 = jax.random.split(key, 10)

    def ref_ffn(x, w1, b1, w2, b2):
        h = jnp.maximum(jnp.einsum("...e,eh->...h", x, w1) + b1, 0.0)
        return jnp.einsum("...h,he->...e", h, w2) + b2

    # ---- Test 1: small module-consistent shapes, resident-weight path ----
    batch, seq, embed, hidden = 2, 8, 32, 64
    x = jax.random.normal(kx, (batch, seq, embed), jnp.float32)
    w1 = jax.random.normal(kw1, (embed, hidden), jnp.float32) / math.sqrt(embed)
    b1 = jax.random.normal(kb1, (hidden,), jnp.float32) * 0.1
    w2 = jax.random.normal(kw2, (hidden, embed), jnp.float32) / math.sqrt(hidden)
    b2 = jax.random.normal(kb2, (embed,), jnp.float32) * 0.1

    out = jax.block_until_ready(feed_forward(x, w1, b1, w2, b2))
    ref = ref_ffn(x, w1, b1, w2, b2)
    assert out.shape == x.shape
    assert jnp.allclose(out, ref, atol=5e-2, rtol=5e-2), "test 1 mismatch"

    # ---- Test 2: forced H-streaming path (2 hidden blocks, 2 token tiles) --
    batch2, seq2, embed2, hidden2 = 2, 16, 128, 256
    x_b = jax.random.normal(kx2, (batch2, seq2, embed2), jnp.float32)
    w1_b = jax.random.normal(kw3, (embed2, hidden2), jnp.float32) / math.sqrt(embed2)
    b1_b = jax.random.normal(kb3, (hidden2,), jnp.float32) * 0.1
    w2_b = jax.random.normal(kw4, (hidden2, embed2), jnp.float32) / math.sqrt(hidden2)
    b2_b = jax.random.normal(kb4, (embed2,), jnp.float32) * 0.1

    out_b = jax.block_until_ready(
        feed_forward(x_b, w1_b, b1_b, w2_b, b2_b, hidden_block=128))
    ref_b = ref_ffn(x_b, w1_b, b1_b, w2_b, b2_b)
    assert out_b.shape == x_b.shape
    assert jnp.allclose(out_b, ref_b, atol=5e-2, rtol=5e-2), "test 2 mismatch"

    print("KERNEL_OK")
</pallas_src>

<mosaic_0001>
module attributes {stable_mosaic.version = 11 : i64} {
  func.func @_ffn_kernel(%arg0: i32, %arg1: i32, %arg2: memref<16x128xbf16, #tpu.memory_space<vmem>>, %arg3: memref<128x64xbf16, #tpu.memory_space<vmem>>, %arg4: memref<1x64xf32, #tpu.memory_space<vmem>>, %arg5: memref<64x128xbf16, #tpu.memory_space<vmem>>, %arg6: memref<1x128xf32, #tpu.memory_space<vmem>>, %arg7: memref<16x128xf32, #tpu.memory_space<vmem>>, %arg8: memref<16x128xf32, #tpu.memory_space<vmem>>) attributes {dimension_semantics = [#tpu.dimension_semantics<parallel>, #tpu.dimension_semantics<arbitrary>], iteration_bounds = array<i64: 1, 1>, scalar_prefetch = 0 : i64, scratch_operands = 1 : i64, tpu.core_type = #tpu.core_type<tc>, window_params = [{transform_indices = @transform_0, window_bounds = array<i64: 16, 128>}, {pipeline_mode = #tpu.pipeline_mode<synchronous>, transform_indices = @transform_1, window_bounds = array<i64: 128, 64>}, {pipeline_mode = #tpu.pipeline_mode<synchronous>, transform_indices = @transform_2, window_bounds = array<i64: 1, 64>}, {pipeline_mode = #tpu.pipeline_mode<synchronous>, transform_indices = @transform_3, window_bounds = array<i64: 64, 128>}, {pipeline_mode = #tpu.pipeline_mode<synchronous>, transform_indices = @transform_4, window_bounds = array<i64: 1, 128>}, {transform_indices = @transform_5, window_bounds = array<i64: 16, 128>}]} {
    %c0_i32 = arith.constant 0 : i32
    %0 = arith.cmpi eq, %arg1, %c0_i32 : i32
    %1 = arith.extui %0 : i1 to i32
    %c0_i32_0 = arith.constant 0 : i32
    %2 = arith.cmpi ne, %1, %c0_i32_0 : i32
    scf.if %2 {
      %cst_16 = arith.constant 0.000000e+00 : f32
      %20 = vector.broadcast %cst_16 : f32 to vector<16x128xf32>
      %c0_17 = arith.constant 0 : index
      %c0_18 = arith.constant 0 : index
      %21 = vector.load %arg8[%c0_17, %c0_18] : memref<16x128xf32, #tpu.memory_space<vmem>>, vector<16x128xf32>
      tpu.vector_store %arg8[%c0_17, %c0_18], %20 {strides = array<i32>} : memref<16x128xf32, #tpu.memory_space<vmem>>, vector<16x128xf32>,
    } else {
    }
    %c0 = arith.constant 0 : index
    %c0_1 = arith.constant 0 : index
    %3 = vector.load %arg2[%c0, %c0_1] : memref<16x128xbf16, #tpu.memory_space<vmem>>, vector<16x128xbf16>
    %c0_2 = arith.constant 0 : index
    %c0_3 = arith.constant 0 : index
    %4 = vector.load %arg3[%c0_2, %c0_3] : memref<128x64xbf16, #tpu.memory_space<vmem>>, vector<128x64xbf16>
    %cst = arith.constant dense<0.000000e+00> : vector<16x64xf32>
    %5 = tpu.matmul %3, %4, %cst {dimension_numbers = #tpu.dot_dimension_numbers<[1], [0], [0], [1], [0, 0, 1, 1], [], []>} : vector<16x128xbf16>, vector<128x64xbf16>, vector<16x64xf32> -> vector<16x64xf32>
    %c0_4 = arith.constant 0 : index
    %c0_5 = arith.constant 0 : index
    %6 = vector.load %arg4[%c0_4, %c0_5] : memref<1x64xf32, #tpu.memory_space<vmem>>, vector<1x64xf32>
    %7 = vector.broadcast %6 : vector<1x64xf32> to vector<16x64xf32>
    %8 = arith.addf %5, %7 : vector<16x64xf32>
    %cst_6 = arith.constant 0.000000e+00 : f32
    %9 = vector.broadcast %cst_6 : f32 to vector<16x64xf32>
    %10 = arith.maximumf %8, %9 : vector<16x64xf32>
    %11 = arith.truncf %10 : vector<16x64xf32> to vector<16x64xbf16>
    %c0_7 = arith.constant 0 : index
    %c0_8 = arith.constant 0 : index
    %12 = vector.load %arg8[%c0_7, %c0_8] : memref<16x128xf32, #tpu.memory_space<vmem>>, vector<16x128xf32>
    %c0_9 = arith.constant 0 : index
    %c0_10 = arith.constant 0 : index
    %13 = vector.load %arg5[%c0_9, %c0_10] : memref<64x128xbf16, #tpu.memory_space<vmem>>, vector<64x128xbf16>
    %cst_11 = arith.constant dense<0.000000e+00> : vector<16x128xf32>
    %14 = tpu.matmul %11, %13, %cst_11 {dimension_numbers = #tpu.dot_dimension_numbers<[1], [0], [0], [1], [0, 0, 1, 1], [], []>} : vector<16x64xbf16>, vector<64x128xbf16>, vector<16x128xf32> -> vector<16x128xf32>
    %15 = arith.addf %12, %14 : vector<16x128xf32>
    %c0_12 = arith.constant 0 : index
    %c0_13 = arith.constant 0 : index
    %16 = vector.load %arg8[%c0_12, %c0_13] : memref<16x128xf32, #tpu.memory_space<vmem>>, vector<16x128xf32>
    tpu.vector_store %arg8[%c0_12, %c0_13], %15 {strides = array<i32>} : memref<16x128xf32, #tpu.memory_space<vmem>>, vector<16x128xf32>,
    %c0_i32_14 = arith.constant 0 : i32
    %17 = arith.cmpi eq, %arg1, %c0_i32_14 : i32
    %18 = arith.extui %17 : i1 to i32
    %c0_i32_15 = arith.constant 0 : i32
    %19 = arith.cmpi ne, %18, %c0_i32_15 : i32
    scf.if %19 {
      %c0_16 = arith.constant 0 : index
      %c0_17 = arith.constant 0 : index
      %20 = vector.load %arg8[%c0_16, %c0_17] : memref<16x128xf32, #tpu.memory_space<vmem>>, vector<16x128xf32>
      %c0_18 = arith.constant 0 : index
      %c0_19 = arith.constant 0 : index
      %21 = vector.load %arg6[%c0_18, %c0_19] : memref<1x128xf32, #tpu.memory_space<vmem>>, vector<1x128xf32>
      %22 = vector.broadcast %21 : vector<1x128xf32> to vector<16x128xf32>
      %23 = arith.addf %20, %22 : vector<16x128xf32>
      %c0_20 = arith.constant 0 : index
      %c0_21 = arith.constant 0 : index
      %24 = vector.load %arg7[%c0_20, %c0_21] : memref<16x128xf32, #tpu.memory_space<vmem>>, vector<16x128xf32>
      tpu.vector_store %arg7[%c0_20, %c0_21], %23 {strides = array<i32>} : memref<16x128xf32, #tpu.memory_space<vmem>>, vector<16x128xf32>,
    } else {
    }
    return
  }
  func.func @transform_0(%arg0: i32, %arg1: i32) -> (i32, i32) {
    %c0_i32 = arith.constant 0 : i32
    %c0_i32_0 = arith.constant 0 : i32
    return %arg0, %c0_i32 : i32, i32
  }
  func.func @transform_1(%arg0: i32, %arg1: i32) -> (i32, i32) {
    %c0_i32 = arith.constant 0 : i32
    %c0_i32_0 = arith.constant 0 : i32
    return %c0_i32, %arg1 : i32, i32
  }
  func.func @transform_2(%arg0: i32, %arg1: i32) -> (i32, i32) {
    %c0_i32 = arith.constant 0 : i32
    %c0_i32_0 = arith.constant 0 : i32
    return %c0_i32, %arg1 : i32, i32
  }
  func.func @transform_3(%arg0: i32, %arg1: i32) -> (i32, i32) {
    %c0_i32 = arith.constant 0 : i32
    %c0_i32_0 = arith.constant 0 : i32
    return %arg1, %c0_i32 : i32, i32
  }
  func.func @transform_4(%arg0: i32, %arg1: i32) -> (i32, i32) {
    %c0_i32 = arith.constant 0 : i32
    %c0_i32_0 = arith.constant 0 : i32
    %c0_i32_1 = arith.constant 0 : i32
    return %c0_i32, %c0_i32_0 : i32, i32
  }
  func.func @transform_5(%arg0: i32, %arg1: i32) -> (i32, i32) {
    %c0_i32 = arith.constant 0 : i32
    %c0_i32_0 = arith.constant 0 : i32
    return %arg0, %c0_i32 : i32, i32
  }
}

module attributes {stable_mosaic.version = 11 : i64} {
  func.func @_ffn_kernel(%arg0: i32, %arg1: i32, %arg2: memref<16x128xbf16, #tpu.memory_space<vmem>>, %arg3: memref<128x64xbf16, #tpu.memory_space<vmem>>, %arg4: memref<1x64xf32, #tpu.memory_space<vmem>>, %arg5: memref<64x128xbf16, #tpu.memory_space<vmem>>, %arg6: memref<1x128xf32, #tpu.memory_space<vmem>>, %arg7: memref<16x128xf32, #tpu.memory_space<vmem>>, %arg8: memref<16x128xf32, #tpu.memory_space<vmem>>) attributes {dimension_semantics = [#tpu.dimension_semantics<parallel>, #tpu.dimension_semantics<arbitrary>], iteration_bounds = array<i64: 1, 1>, scalar_prefetch = 0 : i64, scratch_operands = 1 : i64, tpu.core_type = #tpu.core_type<tc>, window_params = [{transform_indices = @transform_0, window_bounds = array<i64: 16, 128>}, {transform_indices = @transform_1, window_bounds = array<i64: 128, 64>}, {transform_indices = @transform_2, window_bounds = array<i64: 1, 64>}, {transform_indices = @transform_3, window_bounds = array<i64: 64, 128>}, {pipeline_mode = #tpu.pipeline_mode<synchronous>, transform_indices = @transform_4, window_bounds = array<i64: 1, 128>}, {transform_indices = @transform_5, window_bounds = array<i64: 16, 128>}]} {
    %c0_i32 = arith.constant 0 : i32
    %0 = arith.cmpi eq, %arg1, %c0_i32 : i32
    %1 = arith.extui %0 : i1 to i32
    %c0_i32_0 = arith.constant 0 : i32
    %2 = arith.cmpi ne, %1, %c0_i32_0 : i32
    scf.if %2 {
      %cst_16 = arith.constant 0.000000e+00 : f32
      %20 = vector.broadcast %cst_16 : f32 to vector<16x128xf32>
      %c0_17 = arith.constant 0 : index
      %c0_18 = arith.constant 0 : index
      %21 = vector.load %arg8[%c0_17, %c0_18] : memref<16x128xf32, #tpu.memory_space<vmem>>, vector<16x128xf32>
      tpu.vector_store %arg8[%c0_17, %c0_18], %20 {strides = array<i32>} : memref<16x128xf32, #tpu.memory_space<vmem>>, vector<16x128xf32>,
    } else {
    }
    %c0 = arith.constant 0 : index
    %c0_1 = arith.constant 0 : index
    %3 = vector.load %arg2[%c0, %c0_1] : memref<16x128xbf16, #tpu.memory_space<vmem>>, vector<16x128xbf16>
    %c0_2 = arith.constant 0 : index
    %c0_3 = arith.constant 0 : index
    %4 = vector.load %arg3[%c0_2, %c0_3] : memref<128x64xbf16, #tpu.memory_space<vmem>>, vector<128x64xbf16>
    %cst = arith.constant dense<0.000000e+00> : vector<16x64xf32>
    %5 = tpu.matmul %3, %4, %cst {dimension_numbers = #tpu.dot_dimension_numbers<[1], [0], [0], [1], [0, 0, 1, 1], [], []>} : vector<16x128xbf16>, vector<128x64xbf16>, vector<16x64xf32> -> vector<16x64xf32>
    %c0_4 = arith.constant 0 : index
    %c0_5 = arith.constant 0 : index
    %6 = vector.load %arg4[%c0_4, %c0_5] : memref<1x64xf32, #tpu.memory_space<vmem>>, vector<1x64xf32>
    %7 = vector.broadcast %6 : vector<1x64xf32> to vector<16x64xf32>
    %8 = arith.addf %5, %7 : vector<16x64xf32>
    %cst_6 = arith.constant 0.000000e+00 : f32
    %9 = vector.broadcast %cst_6 : f32 to vector<16x64xf32>
    %10 = arith.maximumf %8, %9 : vector<16x64xf32>
    %11 = arith.truncf %10 : vector<16x64xf32> to vector<16x64xbf16>
    %c0_7 = arith.constant 0 : index
    %c0_8 = arith.constant 0 : index
    %12 = vector.load %arg8[%c0_7, %c0_8] : memref<16x128xf32, #tpu.memory_space<vmem>>, vector<16x128xf32>
    %c0_9 = arith.constant 0 : index
    %c0_10 = arith.constant 0 : index
    %13 = vector.load %arg5[%c0_9, %c0_10] : memref<64x128xbf16, #tpu.memory_space<vmem>>, vector<64x128xbf16>
    %cst_11 = arith.constant dense<0.000000e+00> : vector<16x128xf32>
    %14 = tpu.matmul %11, %13, %cst_11 {dimension_numbers = #tpu.dot_dimension_numbers<[1], [0], [0], [1], [0, 0, 1, 1], [], []>} : vector<16x64xbf16>, vector<64x128xbf16>, vector<16x128xf32> -> vector<16x128xf32>
    %15 = arith.addf %12, %14 : vector<16x128xf32>
    %c0_12 = arith.constant 0 : index
    %c0_13 = arith.constant 0 : index
    %16 = vector.load %arg8[%c0_12, %c0_13] : memref<16x128xf32, #tpu.memory_space<vmem>>, vector<16x128xf32>
    tpu.vector_store %arg8[%c0_12, %c0_13], %15 {strides = array<i32>} : memref<16x128xf32, #tpu.memory_space<vmem>>, vector<16x128xf32>,
    %c0_i32_14 = arith.constant 0 : i32
    %17 = arith.cmpi eq, %arg1, %c0_i32_14 : i32
    %18 = arith.extui %17 : i1 to i32
    %c0_i32_15 = arith.constant 0 : i32
    %19 = arith.cmpi ne, %18, %c0_i32_15 : i32
    scf.if %19 {
      %c0_16 = arith.constant 0 : index
      %c0_17 = arith.constant 0 : index
      %20 = vector.load %arg8[%c0_16, %c0_17] : memref<16x128xf32, #tpu.memory_space<vmem>>, vector<16x128xf32>
      %c0_18 = arith.constant 0 : index
      %c0_19 = arith.constant 0 : index
      %21 = vector.load %arg6[%c0_18, %c0_19] : memref<1x128xf32, #tpu.memory_space<vmem>>, vector<1x128xf32>
      %22 = vector.broadcast %21 : vector<1x128xf32> to vector<16x128xf32>
      %23 = arith.addf %20, %22 : vector<16x128xf32>
      %c0_20 = arith.constant 0 : index
      %c0_21 = arith.constant 0 : index
      %24 = vector.load %arg7[%c0_20, %c0_21] : memref<16x128xf32, #tpu.memory_space<vmem>>, vector<16x128xf32>
      tpu.vector_store %arg7[%c0_20, %c0_21], %23 {strides = array<i32>} : memref<16x128xf32, #tpu.memory_space<vmem>>, vector<16x128xf32>,
    } else {
    }
    return
  }
  func.func @transform_0(%arg0: i32, %arg1: i32) -> (i32, i32) {
    %c0_i32 = arith.constant 0 : i32
    %c0_i32_0 = arith.constant 0 : i32
    return %arg0, %c0_i32 : i32, i32
  }
  func.func @transform_1(%arg0: i32, %arg1: i32) -> (i32, i32) {
    %c0_i32 = arith.constant 0 : i32
    %c0_i32_0 = arith.constant 0 : i32
    return %c0_i32, %arg1 : i32, i32
  }
  func.func @transform_2(%arg0: i32, %arg1: i32) -> (i32, i32) {
    %c0_i32 = arith.constant 0 : i32
    %c0_i32_0 = arith.constant 0 : i32
    return %c0_i32, %arg1 : i32, i32
  }
  func.func @transform_3(%arg0: i32, %arg1: i32) -> (i32, i32) {
    %c0_i32 = arith.constant 0 : i32
    %c0_i32_0 = arith.constant 0 : i32
    return %arg1, %c0_i32 : i32, i32
  }
  func.func @transform_4(%arg0: i32, %arg1: i32) -> (i32, i32) {
    %c0_i32 = arith.constant 0 : i32
    %c0_i32_0 = arith.constant 0 : i32
    %c0_i32_1 = arith.constant 0 : i32
    return %c0_i32, %c0_i32_0 : i32, i32
  }
  func.func @transform_5(%arg0: i32, %arg1: i32) -> (i32, i32) {
    %c0_i32 = arith.constant 0 : i32
    %c0_i32_0 = arith.constant 0 : i32
    return %arg0, %c0_i32 : i32, i32
  }
}

</mosaic_0001>

<bundles_post_ra>
// kernel: tpu_custom_call.1
= control target key start
LH: loop header
LB: loop body
LE: loop exit
PB: predicated region body
PF: predicated region fallthrough
CT: control target
= control target key end

     0   :  { %v368_v1 = vmov 0.0   ;;  %vm369_vm0 = vmmov 0   ;;  %s451_s0 = inlined_call_operand.vmem [shape: bf16[16,128], index: 0, kind: input, shape index: {}]   ;;  %s452_s1 = inlined_call_operand.vmem [shape: bf16[128,64], index: 1, kind: input, shape index: {}]   ;;  %s453_s2 = inlined_call_operand.vmem [shape: f32[1,64], index: 2, kind: input, shape index: {}]   ;;  %s454_s3 = inlined_call_operand.vmem [shape: bf16[64,128], index: 3, kind: input, shape index: {}]   ;;  %s455_s4 = inlined_call_operand.vmem [shape: f32[1,128], index: 4, kind: input, shape index: {}]   ;;  %s456_s5 = inlined_call_operand.hbm [shape: f32[16,128], index: 5, kind: output, shape index: {}]  }
   0x1   :  { %v333_v0 = vld [vmem:[%s452_s1 + $0x38] sm:$0xff]   ;;  %296 = vmatprep.subr.bf16.mxu0 %v368_v1  ;;  %316 = vmatprep.subr.bf16.mxu1 %v368_v1  ;;  %v334_v2 = vld [vmem:[%s452_s1 + $0x30] sm:$0xff]   ;;  %v335_v3 = vld [vmem:[%s452_s1 + $0x28] sm:$0xff]  }
   0x2   :  { %297 = vmatpush3.bf16.msra.mxu0 %v333_v0  ;;  %312 = vmatprep.mubr.msk.bf16.mxu0 %vm369_vm0, %v368_v1  ;;  %v342_v4 = vld [vmem:[%s454_s3 + $0x18] sm:$0xff]   ;;  %v336_v5 = vld [vmem:[%s452_s1 + $0x20] sm:$0xff]  }
   0x3   :  { %298 = vmatprep.subr.bf16.mxu0 %v368_v1  ;;  %324 = vmatprep.mubr.msk.bf16.mxu1 %vm369_vm0, %v368_v1 }
   0x4   :  { %317 = vmatpush3.bf16.msra.mxu1 %v342_v4 }
   0x5   :  { %318 = vmatprep.subr.bf16.mxu1 %v368_v1 }
   0x6   :  { %299 = vmatpush3.bf16.msra.mxu0 %v334_v2 }
   0x7   :  { %300 = vmatprep.subr.bf16.mxu0 %v368_v1 }
   0xa   :  { %301 = vmatpush3.bf16.msra.mxu0 %v335_v3 }
   0xb   :  { %302 = vmatprep.subr.bf16.mxu0 %v368_v1 }
   0xc   :  { %10 = vsyncpa [#allocation4], 0  ;;  %v337_v6 = vld [vmem:[%s452_s1 + $0x18] sm:$0xff]   ;;  %v338_v7 = vld [vmem:[%s452_s1 + $0x10] sm:$0xff]   ;;  %vm185_vm1 = vcmask 523264  }
   0xd   :  { %v339_v8 = vld [vmem:[%s452_s1 + $0x8] sm:$0xff]   ;;  %v340_v9 = vld [vmem:[%s452_s1] sm:$0xff]   ;;  %v343_v11 = vld [vmem:[%s454_s3 + $0x10] sm:$0xff]  }
   0xe   :  { %303 = vmatpush3.bf16.msra.mxu0 %v336_v5  ;;  %v341_v10 = vld [vmem:[%s451_s0] sm:$0xff]   ;;  %319 = vmatpush3.bf16.msra.mxu1 %v343_v11  ;;  %v344_v12 = vld [vmem:[%s454_s3 + $0x8] sm:$0xff]  }
   0xf   :  { %304 = vmatprep.subr.bf16.mxu0 %v368_v1  ;;  %320 = vmatprep.subr.bf16.mxu1 %v368_v1  ;;  %v345_v13 = vld [vmem:[%s454_s3] sm:$0xff]   ;;  %s370_s3 = smov [#allocation3]  }
  0x10   :  { %v266_v14 = vld [vmem:[%s453_s2] ss:$0 sm:$0xff]  ;;  %s255_s21 = sshll.u32 %s370_s3, 4  ;;  %s256_s21 = int_to_ptr.vmem [resolvable:$true] %s255_s21 }
  0x11   :  { %v281_v24 = vld [vmem:[%s455_s4] ss:$0 sm:$0xff]  ;;  %s346_s2 = scalar_lea.vmem %s256_s21, 256  ;;  %p351_p1 = scmp.lt.s32.totalorder %s256_s21, %s256_s21 }
  0x12   :  { %305 = vmatpush3.bf16.msra.mxu0 %v337_v6  ;;  %321 = vmatpush3.bf16.msra.mxu1 %v344_v12  ;;  %p347_p0 = scmp.ne.s32.totalorder %s256_s21, %s346_s2  ;;  %p352_p2 = scmp.lt.s32.totalorder %s346_s2, %s346_s2 }
  0x13   :  { %306 = vmatprep.subr.bf16.mxu0 %v368_v1  ;;  %322 = vmatprep.subr.bf16.mxu1 %v368_v1 }
  0x14   :  { %p353_p3 = por %p352_p2, %p351_p1 }
  0x16   :  { %307 = vmatpush3.bf16.msra.mxu0 %v338_v7  ;;  %323 = vmatpush3.bf16.msra.mxu1 %v345_v13  ;;  %p354_p4 = pnand %p353_p3, %p347_p0 }
  0x17   :  { %308 = vmatprep.subr.bf16.mxu0 %v368_v1 }
  0x1a   :  { %309 = vmatpush3.bf16.msra.mxu0 %v339_v8 }
  0x1b   :  { %310 = vmatprep.subr.bf16.mxu0 %v368_v1 }
  0x1e   :  { %311 = vmatpush3.bf16.msra.mxu0 %v340_v9 }
  0x21   :  { %313 = vmatmul.mubr.bf16.vlgmr.msra.gmra.mxu0 %v341_v10 }
  0xe1   :  { %v141_v15 = vpop.f32.mrf.mxu0 }
  0xe2   :  { %v142_v17 = vadd.f32 %v266_v14, %v141_v15 }
  0xe3   :  { %v314_v16 = vpop.f32.mrf.mxu0 }
  0xe4   :  { %v148_v21 = vmax.f32 %v142_v17, 0.0 }
  0xe5   :  { %v144_v18 = vpop.f32.mrf.mxu0 }
  0xe6   :  { %v145_v19 = vadd.f32 %v266_v14, %v144_v18 }
  0xe7   :  { %v315_v20 = vpop.f32.mrf.mxu0 }
  0xe8   :  { %v149_v22 = vmax.f32 %v145_v19, 0.0 }
  0xea   :  { %v150_v23 = vpack.c.bf16 %v149_v22, %v148_v21 }
  0xec   :  { %325 = vmatmul.mubr.msk.bf16.vlgmr.msra.gmra.mxu1 %vm185_vm1, %v150_v23 }
 0x1ac   :  { %v223_v25 = vpop.f32.mrf.mxu1 }
 0x1ad   :  { %v246_v26 = vadd.f32 %v281_v24, %v223_v25 }
 0x1ae   :  { %v326_v27 = vpop.f32.mrf.mxu1 }
 0x1af   :  { %248 = vst [vmem:[#allocation3] sm:$0xff] %v246_v26 }
 0x1b0   :  { %v226_v28 = vpop.f32.mrf.mxu1 }
 0x1b1   :  { %v247_v29 = vadd.f32 %v281_v24, %v226_v28 }
 0x1b2   :  { %v327_v30 = vpop.f32.mrf.mxu1 }
 0x1b3   :  { %249 = vst [vmem:[#allocation3 + $0x8] sm:$0xff] %v247_v29 }
 0x1b4   :  { %357 = shalt.err (!%p354_p4)
}
 0x1b5   :  { %s371_s22 = smov 128   ;;  %s372_s4 = smov 8  }
 0x1b6   :  { %261 = dma.vmem_to_hbm [thread:$0]  %s256_s21, 256, %s456_s5, [#allocation4], %s371_s22, %s371_s22, %s372_s4  }
 0x1b7   :  { %366 = dma.done.wait [#allocation4], 256  }
 0x1b8   :  { %367 = vsyncadd [#allocation4], 4294967040 }
 0x1b9   :  { %265 = vsyncpa [#allocation4], 1 }

// kernel: tpu_custom_call.1
= control target key start
LH: loop header
LB: loop body
LE: loop exit
PB: predicated region body
PF: predicated region fallthrough
CT: control target
= control target key end

     0   :  { %v368_v1 = vmov 0.0   ;;  %vm369_vm0 = vmmov 0   ;;  %s451_s0 = inlined_call_operand.vmem [shape: bf16[16,128], index: 0, kind: input, shape index: {}]   ;;  %s452_s1 = inlined_call_operand.vmem [shape: bf16[128,64], index: 1, kind: input, shape index: {}]   ;;  %s453_s2 = inlined_call_operand.vmem [shape: f32[1,64], index: 2, kind: input, shape index: {}]   ;;  %s454_s3 = inlined_call_operand.vmem [shape: bf16[64,128], index: 3, kind: input, shape index: {}]   ;;  %s455_s4 = inlined_call_operand.vmem [shape: f32[1,128], index: 4, kind: input, shape index: {}]   ;;  %s456_s5 = inlined_call_operand.hbm [shape: f32[16,128], index: 5, kind: output, shape index: {}]  }
   0x1   :  { %v333_v0 = vld [vmem:[%s452_s1 + $0x38] sm:$0xff]   ;;  %296 = vmatprep.subr.bf16.mxu0 %v368_v1  ;;  %316 = vmatprep.subr.bf16.mxu1 %v368_v1  ;;  %v334_v2 = vld [vmem:[%s452_s1 + $0x30] sm:$0xff]   ;;  %v335_v3 = vld [vmem:[%s452_s1 + $0x28] sm:$0xff]  }
   0x2   :  { %297 = vmatpush3.bf16.msra.mxu0 %v333_v0  ;;  %312 = vmatprep.mubr.msk.bf16.mxu0 %vm369_vm0, %v368_v1  ;;  %v342_v4 = vld [vmem:[%s454_s3 + $0x18] sm:$0xff]   ;;  %v336_v5 = vld [vmem:[%s452_s1 + $0x20] sm:$0xff]  }
   0x3   :  { %298 = vmatprep.subr.bf16.mxu0 %v368_v1  ;;  %324 = vmatprep.mubr.msk.bf16.mxu1 %vm369_vm0, %v368_v1 }
   0x4   :  { %317 = vmatpush3.bf16.msra.mxu1 %v342_v4 }
   0x5   :  { %318 = vmatprep.subr.bf16.mxu1 %v368_v1 }
   0x6   :  { %299 = vmatpush3.bf16.msra.mxu0 %v334_v2 }
   0x7   :  { %300 = vmatprep.subr.bf16.mxu0 %v368_v1 }
   0xa   :  { %301 = vmatpush3.bf16.msra.mxu0 %v335_v3 }
   0xb   :  { %302 = vmatprep.subr.bf16.mxu0 %v368_v1 }
   0xc   :  { %10 = vsyncpa [#allocation4], 0  ;;  %v337_v6 = vld [vmem:[%s452_s1 + $0x18] sm:$0xff]   ;;  %v338_v7 = vld [vmem:[%s452_s1 + $0x10] sm:$0xff]   ;;  %vm185_vm1 = vcmask 523264  }
   0xd   :  { %v339_v8 = vld [vmem:[%s452_s1 + $0x8] sm:$0xff]   ;;  %v340_v9 = vld [vmem:[%s452_s1] sm:$0xff]   ;;  %v343_v11 = vld [vmem:[%s454_s3 + $0x10] sm:$0xff]  }
   0xe   :  { %303 = vmatpush3.bf16.msra.mxu0 %v336_v5  ;;  %v341_v10 = vld [vmem:[%s451_s0] sm:$0xff]   ;;  %319 = vmatpush3.bf16.msra.mxu1 %v343_v11  ;;  %v344_v12 = vld [vmem:[%s454_s3 + $0x8] sm:$0xff]  }
   0xf   :  { %304 = vmatprep.subr.bf16.mxu0 %v368_v1  ;;  %320 = vmatprep.subr.bf16.mxu1 %v368_v1  ;;  %v345_v13 = vld [vmem:[%s454_s3] sm:$0xff]   ;;  %s370_s3 = smov [#allocation3]  }
  0x10   :  { %v266_v14 = vld [vmem:[%s453_s2] ss:$0 sm:$0xff]  ;;  %s255_s21 = sshll.u32 %s370_s3, 4  ;;  %s256_s21 = int_to_ptr.vmem [resolvable:$true] %s255_s21 }
  0x11   :  { %v281_v24 = vld [vmem:[%s455_s4] ss:$0 sm:$0xff]  ;;  %s346_s2 = scalar_lea.vmem %s256_s21, 256  ;;  %p351_p1 = scmp.lt.s32.totalorder %s256_s21, %s256_s21 }
  0x12   :  { %305 = vmatpush3.bf16.msra.mxu0 %v337_v6  ;;  %321 = vmatpush3.bf16.msra.mxu1 %v344_v12  ;;  %p347_p0 = scmp.ne.s32.totalorder %s256_s21, %s346_s2  ;;  %p352_p2 = scmp.lt.s32.totalorder %s346_s2, %s346_s2 }
  0x13   :  { %306 = vmatprep.subr.bf16.mxu0 %v368_v1  ;;  %322 = vmatprep.subr.bf16.mxu1 %v368_v1 }
  0x14   :  { %p353_p3 = por %p352_p2, %p351_p1 }
  0x16   :  { %307 = vmatpush3.bf16.msra.mxu0 %v338_v7  ;;  %323 = vmatpush3.bf16.msra.mxu1 %v345_v13  ;;  %p354_p4 = pnand %p353_p3, %p347_p0 }
  0x17   :  { %308 = vmatprep.subr.bf16.mxu0 %v368_v1 }
  0x1a   :  { %309 = vmatpush3.bf16.msra.mxu0 %v339_v8 }
  0x1b   :  { %310 = vmatprep.subr.bf16.mxu0 %v368_v1 }
  0x1e   :  { %311 = vmatpush3.bf16.msra.mxu0 %v340_v9 }
  0x21   :  { %313 = vmatmul.mubr.bf16.vlgmr.msra.gmra.mxu0 %v341_v10 }
  0xe1   :  { %v141_v15 = vpop.f32.mrf.mxu0 }
  0xe2   :  { %v142_v17 = vadd.f32 %v266_v14, %v141_v15 }
  0xe3   :  { %v314_v16 = vpop.f32.mrf.mxu0 }
  0xe4   :  { %v148_v21 = vmax.f32 %v142_v17, 0.0 }
  0xe5   :  { %v144_v18 = vpop.f32.mrf.mxu0 }
  0xe6   :  { %v145_v19 = vadd.f32 %v266_v14, %v144_v18 }
  0xe7   :  { %v315_v20 = vpop.f32.mrf.mxu0 }
  0xe8   :  { %v149_v22 = vmax.f32 %v145_v19, 0.0 }
  0xea   :  { %v150_v23 = vpack.c.bf16 %v149_v22, %v148_v21 }
  0xec   :  { %325 = vmatmul.mubr.msk.bf16.vlgmr.msra.gmra.mxu1 %vm185_vm1, %v150_v23 }
 0x1ac   :  { %v223_v25 = vpop.f32.mrf.mxu1 }
 0x1ad   :  { %v246_v26 = vadd.f32 %v281_v24, %v223_v25 }
 0x1ae   :  { %v326_v27 = vpop.f32.mrf.mxu1 }
 0x1af   :  { %248 = vst [vmem:[#allocation3] sm:$0xff] %v246_v26 }
 0x1b0   :  { %v226_v28 = vpop.f32.mrf.mxu1 }
 0x1b1   :  { %v247_v29 = vadd.f32 %v281_v24, %v226_v28 }
 0x1b2   :  { %v327_v30 = vpop.f32.mrf.mxu1 }
 0x1b3   :  { %249 = vst [vmem:[#allocation3 + $0x8] sm:$0xff] %v247_v29 }
 0x1b4   :  { %357 = shalt.err (!%p354_p4)
}
 0x1b5   :  { %s371_s22 = smov 128   ;;  %s372_s4 = smov 8  }
 0x1b6   :  { %261 = dma.vmem_to_hbm [thread:$0]  %s256_s21, 256, %s456_s5, [#allocation4], %s371_s22, %s371_s22, %s372_s4  }
 0x1b7   :  { %366 = dma.done.wait [#allocation4], 256  }
 0x1b8   :  { %367 = vsyncadd [#allocation4], 4294967040 }
 0x1b9   :  { %265 = vsyncpa [#allocation4], 1 }

</bundles_post_ra>
